<compile_context>
chip_gen: v7x
topology: tpu7x:2x2x1
jax: 0.10.0
libtpu: 0.0.40
codegen_flags: <defaults>
</compile_context>

<pallas_src>
import functools
import math

import jax
import jax.numpy as jnp
from jax.experimental import pallas as pl
from jax.experimental.pallas import tpu as pltpu


def linear_block_kernel(x_ref, w_ref, b_ref, o_ref, *, act):
    # MXU matmul (f32 accumulate) + VPU bias/activation.  The kernel is
    # memory bound, so HIGHEST precision on the matmul is effectively free
    # and keeps bit-level parity with an f32 reference.
    x = x_ref[...]
    y = jnp.dot(
        x,
        w_ref[...],
        preferred_element_type=jnp.float32,
        precision=jax.lax.Precision.HIGHEST,
    )
    y = y + b_ref[...]
    if act == "sigmoid":
        y = jax.nn.sigmoid(y)       # EUP
    elif act == "tanh":
        y = jnp.tanh(y)             # EUP
    else:                           # 'relu' and any unknown act (matches module default)
        y = jnp.maximum(y, 0.0)     # VPU
    o_ref[...] = y.astype(o_ref.dtype)


def linear_block_forward(x, w, b, act="relu", *, tile_m=None, cast_matmul_to_bf16=False):
    """LinearBlock forward.

    x: (..., dim_in) float32
    w: (dim_in, dim_out)  -- transpose of PyTorch's (dim_out, dim_in) weight
    b: (dim_out,) or (1, dim_out)
    Returns (..., dim_out) float32.
    """
    *lead, dim_in = x.shape
    dim_out = w.shape[1]

    x2d = x.reshape(-1, dim_in)
    n = x2d.shape[0]
    b2d = b.reshape(1, dim_out).astype(jnp.float32)

    if cast_matmul_to_bf16:
        # Halves HBM traffic for the dominant x stream; accumulate stays f32.
        x2d = x2d.astype(jnp.bfloat16)
        w = w.astype(jnp.bfloat16)

    # ---- Batch tile selection -------------------------------------------
    # Big tiles amortize per-step overhead; cap so two double-buffered x
    # tiles (~2 * 16 MiB) plus weights stay well under v7x's 64 MiB VMEM.
    bytes_per_row = dim_in * x2d.dtype.itemsize
    per_buffer_budget = 16 * 1024 * 1024
    tm_cap = max(8, (per_buffer_budget // max(bytes_per_row, 1)) // 8 * 8)
    tm = min(1024, tm_cap)
    if tile_m is not None:
        tm = max(8, (tile_m // 8) * 8)

    if n <= tm:
        # Single grid step: full-extent block (no (8,128) divisibility needed).
        tm = n
        n_pad = n
    else:
        n_pad = pl.cdiv(n, tm) * tm

    x_p = x2d if n_pad == n else jnp.pad(x2d, ((0, n_pad - n), (0, 0)))
    grid = (n_pad // tm,)

    # Explicit VMEM limit (double-buffered x + out tiles, resident weights).
    x_tile_bytes = tm * dim_in * x_p.dtype.itemsize
    out_tile_bytes = tm * dim_out * 4
    w_bytes = dim_in * dim_out * w.dtype.itemsize
    needed = 2 * x_tile_bytes + 2 * out_tile_bytes + w_bytes + dim_out * 4 + (2 << 20)
    vmem_limit = int(min(max(needed, 16 << 20), 48 << 20))

    kernel = functools.partial(linear_block_kernel, act=act)

    out = pl.pallas_call(
        kernel,
        out_shape=jax.ShapeDtypeStruct((n_pad, dim_out), jnp.float32),
        grid=grid,
        in_specs=[
            pl.BlockSpec((tm, dim_in), lambda i: (i, 0)),       # streamed x tiles
            pl.BlockSpec((dim_in, dim_out), lambda i: (0, 0)),  # resident weight
            pl.BlockSpec((1, dim_out), lambda i: (0, 0)),       # resident bias
        ],
        out_specs=pl.BlockSpec((tm, dim_out), lambda i: (i, 0)),
        compiler_params=pltpu.CompilerParams(
            dimension_semantics=("parallel",),
            vmem_limit_bytes=vmem_limit,
        ),
    )(x_p, w, b2d)

    out = out[:n]
    return out.reshape(*lead, dim_out)


if __name__ == "__main__":
    # Small shapes consistent with the module: x (batch=2, seq=8, dim_in=128),
    # LinearBlock(128, 32, act='relu').  nn.Linear applies over the last dim.
    B, S, DIM_IN, DIM_OUT = 2, 8, 128, 32

    key = jax.random.PRNGKey(0)
    kx, kw, kb = jax.random.split(key, 3)

    x = jax.random.normal(kx, (B, S, DIM_IN), dtype=jnp.float32)

    # PyTorch default init: U(-1/sqrt(dim_in), 1/sqrt(dim_in)); weight is (out, in).
    bound = 1.0 / math.sqrt(DIM_IN)
    w_pt = jax.random.uniform(kw, (DIM_OUT, DIM_IN), minval=-bound, maxval=bound,
                              dtype=jnp.float32)
    b = jax.random.uniform(kb, (DIM_OUT,), minval=-bound, maxval=bound,
                           dtype=jnp.float32)
    w = w_pt.T  # store transposed (dim_in, dim_out) for x @ W on the MXU

    out = linear_block_forward(x, w, b, act="relu")
    out = jax.block_until_ready(out)

    # Pure-JAX reference of the same forward pass.
    ref = jnp.maximum(jnp.einsum("bsi,io->bso", x, w) + b, 0.0)
    assert out.shape == (B, S, DIM_OUT)
    assert jnp.allclose(out, ref, atol=1e-5, rtol=1e-5)

    print("KERNEL_OK")
</pallas_src>

<mosaic_0001>
module attributes {stable_mosaic.version = 11 : i64} {
  func.func @linear_block_kernel(%arg0: i32, %arg1: memref<16x128xf32, #tpu.memory_space<vmem>>, %arg2: memref<128x32xf32, #tpu.memory_space<vmem>>, %arg3: memref<1x32xf32, #tpu.memory_space<vmem>>, %arg4: memref<16x32xf32, #tpu.memory_space<vmem>>) attributes {dimension_semantics = [#tpu.dimension_semantics<parallel>], iteration_bounds = array<i64: 1>, scalar_prefetch = 0 : i64, scratch_operands = 0 : i64, tpu.core_type = #tpu.core_type<tc>, window_params = [{transform_indices = @transform_0, window_bounds = array<i64: 16, 128>}, {pipeline_mode = #tpu.pipeline_mode<synchronous>, transform_indices = @transform_1, window_bounds = array<i64: 128, 32>}, {pipeline_mode = #tpu.pipeline_mode<synchronous>, transform_indices = @transform_2, window_bounds = array<i64: 1, 32>}, {transform_indices = @transform_3, window_bounds = array<i64: 16, 32>}]} {
    %c0 = arith.constant 0 : index
    %c0_0 = arith.constant 0 : index
    %0 = vector.load %arg1[%c0, %c0_0] : memref<16x128xf32, #tpu.memory_space<vmem>>, vector<16x128xf32>
    %c0_1 = arith.constant 0 : index
    %c0_2 = arith.constant 0 : index
    %1 = vector.load %arg2[%c0_1, %c0_2] : memref<128x32xf32, #tpu.memory_space<vmem>>, vector<128x32xf32>
    %cst = arith.constant dense<0.000000e+00> : vector<16x32xf32>
    %2 = tpu.matmul %0, %1, %cst {dimension_numbers = #tpu.dot_dimension_numbers<[1], [0], [0], [1], [0, 0, 1, 1], [], []>, precision = #tpu.contract_precision<fp32>} : vector<16x128xf32>, vector<128x32xf32>, vector<16x32xf32> -> vector<16x32xf32>
    %c0_3 = arith.constant 0 : index
    %c0_4 = arith.constant 0 : index
    %3 = vector.load %arg3[%c0_3, %c0_4] : memref<1x32xf32, #tpu.memory_space<vmem>>, vector<1x32xf32>
    %4 = vector.broadcast %3 : vector<1x32xf32> to vector<16x32xf32>
    %5 = arith.addf %2, %4 : vector<16x32xf32>
    %cst_5 = arith.constant 0.000000e+00 : f32
    %6 = vector.broadcast %cst_5 : f32 to vector<16x32xf32>
    %7 = arith.maximumf %5, %6 : vector<16x32xf32>
    %c0_6 = arith.constant 0 : index
    %c0_7 = arith.constant 0 : index
    %8 = vector.load %arg4[%c0_6, %c0_7] : memref<16x32xf32, #tpu.memory_space<vmem>>, vector<16x32xf32>
    tpu.vector_store %arg4[%c0_6, %c0_7], %7 {strides = array<i32>} : memref<16x32xf32, #tpu.memory_space<vmem>>, vector<16x32xf32>,
    return
  }
  func.func @transform_0(%arg0: i32) -> (i32, i32) {
    %c0_i32 = arith.constant 0 : i32
    %c0_i32_0 = arith.constant 0 : i32
    return %arg0, %c0_i32 : i32, i32
  }
  func.func @transform_1(%arg0: i32) -> (i32, i32) {
    %c0_i32 = arith.constant 0 : i32
    %c0_i32_0 = arith.constant 0 : i32
    %c0_i32_1 = arith.constant 0 : i32
    return %c0_i32, %c0_i32_0 : i32, i32
  }
  func.func @transform_2(%arg0: i32) -> (i32, i32) {
    %c0_i32 = arith.constant 0 : i32
    %c0_i32_0 = arith.constant 0 : i32
    %c0_i32_1 = arith.constant 0 : i32
    return %c0_i32, %c0_i32_0 : i32, i32
  }
  func.func @transform_3(%arg0: i32) -> (i32, i32) {
    %c0_i32 = arith.constant 0 : i32
    %c0_i32_0 = arith.constant 0 : i32
    return %arg0, %c0_i32 : i32, i32
  }
}

</mosaic_0001>

<bundles_post_ra>
// kernel: tpu_custom_call.1
= control target key start
LH: loop header
LB: loop body
LE: loop exit
PB: predicated region body
PF: predicated region fallthrough
CT: control target
= control target key end

     0   :  { %s1653_s0 = inlined_call_operand.vmem [shape: f32[16,128], index: 0, kind: input, shape index: {}]   ;;  %s1654_s1 = inlined_call_operand.vmem [shape: f32[128,32], index: 1, kind: input, shape index: {}]   ;;  %s1655_s2 = inlined_call_operand.vmem [shape: f32[1,32], index: 2, kind: input, shape index: {}]   ;;  %s1656_s3 = inlined_call_operand.hbm [shape: f32[16,32], index: 3, kind: output, shape index: {}]  }
   0x1   :  { %v17_v0 = vld [vmem:[%s1654_s1] sm:$0xff]  ;;  %v18_v1 = vld [vmem:[%s1654_s1 + $0x8] sm:$0xff]  ;;  %v19_v2 = vld [vmem:[%s1654_s1 + $0x10] sm:$0xff] }
   0x2   :  { %v41_v3 = vand.u32 4294901760, %v17_v0  ;;  %v44_v4 = vand.u32 4294901760, %v18_v1  ;;  %v1330_v5 = vld [vmem:[%s1654_s1 + $0x18] sm:$0xff]  ;;  %v47_v6 = vand.u32 4294901760, %v19_v2  ;;  %v1335_v7 = vld [vmem:[%s1654_s1 + $0x20] sm:$0xff]  ;;  %v1340_v8 = vld [vmem:[%s1654_s1 + $0x28] sm:$0xff] }
   0x3   :  { %v50_v9 = vand.u32 4294901760, %v1330_v5  ;;  %v53_v11 = vand.u32 4294901760, %v1335_v7  ;;  %v56_v12 = vand.u32 4294901760, %v1340_v8  ;;  %v1352_v14 = vld [vmem:[%s1654_s1 + $0x30] sm:$0xff]  ;;  %v1357_v15 = vld [vmem:[%s1654_s1 + $0x38] sm:$0xff]  ;;  %v15_v16 = vld [vmem:[%s1653_s0] sm:$0xff] }
   0x4   :  { %v1343_v10 = vpack.c.bf16 %v44_v4, %v41_v3  ;;  %v1366_v17 = vand.u32 4294901760, %v15_v16  ;;  %v59_v19 = vand.u32 4294901760, %v1352_v14  ;;  %v62_v20 = vand.u32 4294901760, %v1357_v15 }
   0x5   :  { %v1347_v13 = vpack.c.bf16 %v50_v9, %v47_v6  ;;  %v1374_v18 = vpack.c.bf16 %v56_v12, %v53_v11 }
   0x6   :  { %1065 = vmatprep.subr.bf16.mxu1 %v1343_v10  ;;  %1161 = vmatprep.subr.bf16.mxu0 %v1343_v10 }
   0x7   :  { %1067 = vmatpush3.bf16.msra.mxu1 %v1343_v10  ;;  %1163 = vmatpush3.bf16.msra.mxu0 %v1343_v10 }
   0x8   :  { %1069 = vmatprep.subr.bf16.mxu1 %v1347_v13  ;;  %1165 = vmatprep.subr.bf16.mxu0 %v1347_v13 }
   0x9   :  { %8 = vsyncpa [#allocation3], 0  ;;  %v1381_v21 = vld [vmem:[%s1654_s1 + $0x40] sm:$0xff]  ;;  %v1386_v22 = vld [vmem:[%s1654_s1 + $0x48] sm:$0xff]  ;;  %v1389_v23 = vsub.f32 %v15_v16, %v1366_v17  ;;  %v1400_v25 = vpack.c.bf16 %v62_v20, %v59_v19  ;;  %v1440_v38 = vsub.f32 %v17_v0, %v41_v3  ;;  %v1442_v39 = vsub.f32 %v18_v1, %v44_v4  ;;  %s1295_s21 = smov [#allocation2]  }
   0xa   :  { %v65_v26 = vand.u32 4294901760, %v1381_v21  ;;  %v68_v27 = vand.u32 4294901760, %v1386_v22  ;;  %v1407_v28 = vld [vmem:[%s1654_s1 + $0x50] sm:$0xff]  ;;  %v1412_v29 = vld [vmem:[%s1654_s1 + $0x58] sm:$0xff]  ;;  %v16_v33 = vld [vmem:[%s1653_s0 + $0x8] sm:$0xff]  ;;  %v1460_v45 = vsub.f32 %v19_v2, %v47_v6  ;;  %v1473_v49 = vsub.f32 %v1330_v5, %v50_v9  ;;  %s734_s22 = sshll.u32 %s1295_s21, 4  ;;  %s735_s22 = int_to_ptr.vmem [resolvable:$true] %s734_s22 }
   0xb   :  { %1071 = vmatpush3.bf16.msra.mxu1 %v1347_v13  ;;  %1167 = vmatpush3.bf16.msra.mxu0 %v1347_v13  ;;  %v123_v24 = vand.u32 4294901760, %v1389_v23  ;;  %v71_v31 = vand.u32 4294901760, %v1407_v28  ;;  %v74_v35 = vand.u32 4294901760, %v1412_v29  ;;  %v1433_v36 = vld [vmem:[%s1654_s1 + $0x60] sm:$0xff]  ;;  %v1438_v37 = vld [vmem:[%s1654_s1 + $0x68] sm:$0xff]  ;;  %v1444_v40 = vand.u32 4294901760, %v16_v33  ;;  %p1276_p1 = scmp.lt.s32.totalorder %s735_s22, %s735_s22 }
   0xc   :  { %1073 = vmatprep.subr.bf16.mxu1 %v1374_v18  ;;  %1169 = vmatprep.subr.bf16.mxu0 %v1374_v18  ;;  %v1427_v34 = vpack.c.bf16 %v68_v27, %v65_v26  ;;  %v77_v41 = vand.u32 4294901760, %v1433_v36  ;;  %v80_v42 = vand.u32 4294901760, %v1438_v37  ;;  %v1453_v43 = vld [vmem:[%s1654_s1 + $0x70] sm:$0xff]  ;;  %v1458_v44 = vld [vmem:[%s1654_s1 + $0x78] sm:$0xff]  ;;  %v144_v47 = vand.u32 4294901760, %v1440_v38  ;;  %s1271_s23 = scalar_lea.vmem %s735_s22, 256 }
   0xd   :  { %v124_v30 = vsub.f32 %v1389_v23, %v123_v24  ;;  %991 = vmatprep.mubr.f32.mxu0 %v123_v24  ;;  %v1468_v46 = vpack.c.bf16 %v74_v35, %v71_v31  ;;  %v151_v48 = vand.u32 4294901760, %v1442_v39  ;;  %v83_v50 = vand.u32 4294901760, %v1453_v43  ;;  %p1272_p0 = scmp.ne.s32.totalorder %s735_s22, %s1271_s23  ;;  %p1277_p2 = scmp.lt.s32.totalorder %s1271_s23, %s1271_s23 }
   0xe   :  { %v86_v51 = vand.u32 4294901760, %v1458_v44  ;;  %v1478_v52 = vsub.f32 %v16_v33, %v1444_v40  ;;  %v1486_v53 = vpack.c.bf16 %v80_v42, %v77_v41  ;;  %v158_v54 = vand.u32 4294901760, %v1460_v45 }
   0xf   :  { %1075 = vmatpush3.bf16.msra.mxu1 %v1374_v18  ;;  %1171 = vmatpush3.bf16.msra.mxu0 %v1374_v18  ;;  %v125_v32 = vand.u32 4294901760, %v124_v30  ;;  %v1492_v55 = vsub.f32 %v1335_v7, %v53_v11  ;;  %v145_v56 = vsub.f32 %v1440_v38, %v144_v47  ;;  %v152_v57 = vsub.f32 %v1442_v39, %v151_v48  ;;  %p1278_p3 = por %p1277_p2, %p1276_p1 }
  0x10   :  { %1077 = vmatprep.subr.bf16.mxu1 %v1400_v25  ;;  %1173 = vmatprep.subr.bf16.mxu0 %v1400_v25  ;;  %v165_v58 = vand.u32 4294901760, %v1473_v49  ;;  %v1502_v59 = vsub.f32 %v1340_v8, %v56_v12  ;;  %v1508_v60 = vpack.c.bf16 %v86_v51, %v83_v50  ;;  %v133_v61 = vand.u32 4294901760, %v1478_v52 }
  0x11   :  { %886 = vmatprep.mubr.f32.mxu1 %v125_v32  ;;  %v159_v62 = vsub.f32 %v1460_v45, %v158_v54  ;;  %v172_v63 = vand.u32 4294901760, %v1492_v55  ;;  %v1518_v0 = vsub.f32 %v1352_v14, %v59_v19  ;;  %v1523_v1 = vsub.f32 %v1357_v15, %v62_v20  ;;  %p1279_p4 = pnand %p1278_p3, %p1272_p0 }
  0x12   :  { %v146_v2 = vand.u32 4294901760, %v145_v56  ;;  %v153_v3 = vand.u32 4294901760, %v152_v57  ;;  %v166_v4 = vsub.f32 %v1473_v49, %v165_v58  ;;  %v179_v5 = vand.u32 4294901760, %v1502_v59 }
  0x13   :  { %1079 = vmatpush3.bf16.msra.mxu1 %v1400_v25  ;;  %1175 = vmatpush3.bf16.msra.mxu0 %v1400_v25  ;;  %v1192_v6 = vpack.c.bf16 %v151_v48, %v144_v47  ;;  %v134_v7 = vsub.f32 %v1478_v52, %v133_v61  ;;  %v1533_v8 = vsub.f32 %v1381_v21, %v65_v26  ;;  %v160_v9 = vand.u32 4294901760, %v159_v62 }
  0x14   :  { %1081 = vmatprep.subr.bf16.mxu1 %v1427_v34  ;;  %1177 = vmatprep.subr.bf16.mxu0 %v1427_v34  ;;  %v173_v11 = vsub.f32 %v1492_v55, %v172_v63  ;;  %v186_v12 = vand.u32 4294901760, %v1518_v0  ;;  %v193_v14 = vand.u32 4294901760, %v1523_v1  ;;  %v1096_v15 = vpack.c.bf16 %v153_v3, %v146_v2 }
  0x15   :  { %v167_v16 = vand.u32 4294901760, %v166_v4  ;;  %v180_v19 = vsub.f32 %v1502_v59, %v179_v5  ;;  %v1546_v20 = vsub.f32 %v1386_v22, %v68_v27  ;;  %v135_v21 = vand.u32 4294901760, %v134_v7 }
  0x16   :  { %v1196_v24 = vpack.c.bf16 %v165_v58, %v158_v54  ;;  %v200_v26 = vand.u32 4294901760, %v1533_v8  ;;  %v1552_v30 = vsub.f32 %v1407_v28, %v71_v31  ;;  %v187_v32 = vsub.f32 %v1518_v0, %v186_v12 }
  0x17   :  { %1083 = vmatpush3.bf16.msra.mxu1 %v1427_v34  ;;  %1179 = vmatpush3.bf16.msra.mxu0 %v1427_v34  ;;  %v194_v33 = vsub.f32 %v1523_v1, %v193_v14  ;;  %v1561_v22 = vsub.f32 %v1412_v29, %v74_v35  ;;  %v1100_v27 = vpack.c.bf16 %v167_v16, %v160_v9  ;;  %v174_v47 = vand.u32 4294901760, %v173_v11 }
  0x18   :  { %1085 = vmatprep.subr.bf16.mxu1 %v1468_v46  ;;  %1181 = vmatprep.subr.bf16.mxu0 %v1468_v46  ;;  %v181_v48 = vand.u32 4294901760, %v180_v19  ;;  %v207_v28 = vand.u32 4294901760, %v1546_v20  ;;  %v1200_v31 = vpack.c.bf16 %v179_v5, %v172_v63  ;;  %v201_v54 = vsub.f32 %v1533_v8, %v200_v26 }
  0x19   :  { %v1568_v56 = vsub.f32 %v1433_v36, %v77_v41  ;;  %v188_v29 = vand.u32 4294901760, %v187_v32  ;;  %v195_v35 = vand.u32 4294901760, %v194_v33  ;;  %v214_v57 = vand.u32 4294901760, %v1552_v30 }
  0x1a   :  { %v221_v58 = vand.u32 4294901760, %v1561_v22  ;;  %v1104_v62 = vpack.c.bf16 %v181_v48, %v174_v47  ;;  %v1576_v63 = vsub.f32 %v1438_v37, %v80_v42  ;;  %v1204_v36 = vpack.c.bf16 %v193_v14, %v186_v12 }
  0x1b   :  { %1087 = vmatpush3.bf16.msra.mxu1 %v1468_v46  ;;  %1183 = vmatpush3.bf16.msra.mxu0 %v1468_v46  ;;  %v202_v41 = vand.u32 4294901760, %v201_v54  ;;  %v1108_v2 = vpack.c.bf16 %v195_v35, %v188_v29  ;;  %v215_v3 = vsub.f32 %v1552_v30, %v214_v57  ;;  %v228_v5 = vand.u32 4294901760, %v1568_v56 }
  0x1c   :  { %1089 = vmatprep.subr.bf16.mxu1 %v1486_v53  ;;  %1185 = vmatprep.subr.bf16.mxu0 %v1486_v53  ;;  %v222_v4 = vsub.f32 %v1561_v22, %v221_v58  ;;  %v235_v37 = vand.u32 4294901760, %v1576_v63  ;;  %v1587_v42 = vsub.f32 %v1453_v43, %v83_v50  ;;  %v1592_v7 = vsub.f32 %v1458_v44, %v86_v51 }
  0x1d   :  { %v1208_v9 = vpack.c.bf16 %v207_v28, %v200_v26  ;;  %v216_v11 = vand.u32 4294901760, %v215_v3  ;;  %v229_v14 = vsub.f32 %v1568_v56, %v228_v5  ;;  %v1212_v51 = vpack.c.bf16 %v221_v58, %v214_v57 }
  0x1e   :  { %v223_v12 = vand.u32 4294901760, %v222_v4  ;;  %v236_v16 = vsub.f32 %v1576_v63, %v235_v37  ;;  %v242_v43 = vand.u32 4294901760, %v1587_v42  ;;  %v249_v50 = vand.u32 4294901760, %v1592_v7 }
  0x1f   :  { %1091 = vmatpush3.bf16.msra.mxu1 %v1486_v53  ;;  %1187 = vmatpush3.bf16.msra.mxu0 %v1486_v53  ;;  %v230_v19 = vand.u32 4294901760, %v229_v14  ;;  %v1216_v33 = vpack.c.bf16 %v235_v37, %v228_v5  ;;  %v1132_v54 = vpack.c.bf16 %v1473_v49, %v1460_v45  ;;  %vm726_vm0 = vcmask 261120  }
  0x20   :  { %1093 = vmatprep.subr.bf16.mxu1 %v1508_v60  ;;  %1189 = vmatprep.subr.bf16.mxu0 %v1508_v60  ;;  %v1116_v44 = vpack.c.bf16 %v223_v12, %v216_v11  ;;  %v250_v26 = vsub.f32 %v1592_v7, %v249_v50 }
  0x22   :  { %v251_v47 = vand.u32 4294901760, %v250_v26 }
  0x23   :  { %1095 = vmatpush3.bf16.msra.mxu1 %v1508_v60  ;;  %1191 = vmatpush3.bf16.msra.mxu0 %v1508_v60 }
  0x24   :  { %1097 = vmatprep.subr.bf16.mxu1 %v1096_v15  ;;  %1193 = vmatprep.subr.bf16.mxu0 %v1192_v6 }
  0x26   :  { %887 = vmatmul.mubr.f32.vlgmr.msra.gmra.mrb[0].mxu1 %v135_v21  ;;  %992 = vmatmul.mubr.f32.vlgmr.msra.gmra.mrb[0].mxu0 %v133_v61  ;;  %v208_v61 = vsub.f32 %v1546_v20, %v207_v28  ;;  %v237_v21 = vand.u32 4294901760, %v236_v16  ;;  %v1220_v28 = vpack.c.bf16 %v249_v50, %v242_v43 }
  0x27   :  { %1099 = vmatpush3.bf16.msra.mxu1 %v1096_v15  ;;  %1195 = vmatpush3.bf16.msra.mxu0 %v1192_v6 }
  0x28   :  { %1101 = vmatprep.subr.bf16.mxu1 %v1100_v27  ;;  %1197 = vmatprep.subr.bf16.mxu0 %v1196_v24  ;;  %v209_v6 = vand.u32 4294901760, %v208_v61  ;;  %v1120_v32 = vpack.c.bf16 %v237_v21, %v230_v19 }
  0x29   :  { %921 = vmatprep.mubr.f32.mxu1 %v1366_v17  ;;  %1026 = vmatprep.mubr.f32.mxu0 %v1366_v17 }
  0x2a   :  { %v1112_v15 = vpack.c.bf16 %v209_v6, %v202_v41 }
  0x2b   :  { %1103 = vmatpush3.bf16.msra.mxu1 %v1100_v27  ;;  %1199 = vmatpush3.bf16.msra.mxu0 %v1196_v24  ;;  %v243_v24 = vsub.f32 %v1587_v42, %v242_v43 }
  0x2c   :  { %1105 = vmatprep.subr.bf16.mxu1 %v1104_v62  ;;  %1201 = vmatprep.subr.bf16.mxu0 %v1200_v31 }
  0x2d   :  { %v244_v27 = vand.u32 4294901760, %v243_v24 }
  0x2f   :  { %1107 = vmatpush3.bf16.msra.mxu1 %v1104_v62  ;;  %1203 = vmatpush3.bf16.msra.mxu0 %v1200_v31  ;;  %v1124_v48 = vpack.c.bf16 %v251_v47, %v244_v27  ;;  %v1128_v31 = vpack.c.bf16 %v1442_v39, %v1440_v38  ;;  %v1136_v38 = vpack.c.bf16 %v1502_v59, %v1492_v55 }
  0x30   :  { %1109 = vmatprep.subr.bf16.mxu1 %v1108_v2  ;;  %1205 = vmatprep.subr.bf16.mxu0 %v1204_v36  ;;  %v1140_v39 = vpack.c.bf16 %v1523_v1, %v1518_v0 }
  0x33   :  { %1111 = vmatpush3.bf16.msra.mxu1 %v1108_v2  ;;  %1207 = vmatpush3.bf16.msra.mxu0 %v1204_v36 }
  0x34   :  { %1113 = vmatprep.subr.bf16.mxu1 %v1112_v15  ;;  %1209 = vmatprep.subr.bf16.mxu0 %v1208_v9 }
  0x37   :  { %1115 = vmatpush3.bf16.msra.mxu1 %v1112_v15  ;;  %1211 = vmatpush3.bf16.msra.mxu0 %v1208_v9 }
  0x38   :  { %1117 = vmatprep.subr.bf16.mxu1 %v1116_v44  ;;  %1213 = vmatprep.subr.bf16.mxu0 %v1212_v51 }
  0x3b   :  { %1119 = vmatpush3.bf16.msra.mxu1 %v1116_v44  ;;  %1215 = vmatpush3.bf16.msra.mxu0 %v1212_v51 }
  0x3c   :  { %1121 = vmatprep.subr.bf16.mxu1 %v1120_v32  ;;  %1217 = vmatprep.subr.bf16.mxu0 %v1216_v33 }
  0x3f   :  { %1123 = vmatpush3.bf16.msra.mxu1 %v1120_v32  ;;  %1219 = vmatpush3.bf16.msra.mxu0 %v1216_v33 }
  0x40   :  { %1125 = vmatprep.subr.bf16.mxu1 %v1124_v48  ;;  %1221 = vmatprep.subr.bf16.mxu0 %v1220_v28 }
  0x43   :  { %1127 = vmatpush3.bf16.msra.mxu1 %v1124_v48  ;;  %1223 = vmatpush3.bf16.msra.mxu0 %v1220_v28 }
  0x44   :  { %1129 = vmatprep.subr.bf16.mxu1 %v1128_v31  ;;  %1225 = vmatprep.subr.bf16.mxu0 %v1343_v10 }
  0x46   :  { %922 = vmatmul.mubr.f32.vlgmr.msra.gmra.mrb[0].mxu1 %v1444_v40  ;;  %1027 = vmatmul.mubr.f32.vlgmr.msra.gmra.mrb[0].mxu0 %v1444_v40 }
  0x47   :  { %1131 = vmatpush3.bf16.msra.mxu1 %v1128_v31  ;;  %1227 = vmatpush3.bf16.msra.mxu0 %v1343_v10  ;;  %v1144_v10 = vpack.c.bf16 %v1546_v20, %v1533_v8 }
  0x48   :  { %1133 = vmatprep.subr.bf16.mxu1 %v1132_v54  ;;  %1229 = vmatprep.subr.bf16.mxu0 %v1347_v13 }
  0x49   :  { %956 = vmatprep.mubr.f32.mxu1 %v1389_v23  ;;  %1061 = vmatprep.mubr.f32.mxu0 %v1366_v17  ;;  %v1152_v17 = vpack.c.bf16 %v1576_v63, %v1568_v56  ;;  %v745_v23 = vld [vmem:[%s1655_s2] ss:$0 sm:$0xff] }
  0x4b   :  { %1135 = vmatpush3.bf16.msra.mxu1 %v1132_v54  ;;  %1231 = vmatpush3.bf16.msra.mxu0 %v1347_v13  ;;  %v1148_v13 = vpack.c.bf16 %v1561_v22, %v1552_v30 }
  0x4c   :  { %1137 = vmatprep.subr.bf16.mxu1 %v1136_v38  ;;  %1233 = vmatprep.subr.bf16.mxu0 %v1374_v18 }
  0x4f   :  { %1139 = vmatpush3.bf16.msra.mxu1 %v1136_v38  ;;  %1235 = vmatpush3.bf16.msra.mxu0 %v1374_v18  ;;  %v1156_v18 = vpack.c.bf16 %v1592_v7, %v1587_v42 }
  0x50   :  { %1141 = vmatprep.subr.bf16.mxu1 %v1140_v39  ;;  %1237 = vmatprep.subr.bf16.mxu0 %v1400_v25 }
  0x53   :  { %1143 = vmatpush3.bf16.msra.mxu1 %v1140_v39  ;;  %1239 = vmatpush3.bf16.msra.mxu0 %v1400_v25 }
  0x54   :  { %1145 = vmatprep.subr.bf16.mxu1 %v1144_v10  ;;  %1241 = vmatprep.subr.bf16.mxu0 %v1427_v34 }
  0x57   :  { %1147 = vmatpush3.bf16.msra.mxu1 %v1144_v10  ;;  %1243 = vmatpush3.bf16.msra.mxu0 %v1427_v34 }
  0x58   :  { %1149 = vmatprep.subr.bf16.mxu1 %v1148_v13  ;;  %1245 = vmatprep.subr.bf16.mxu0 %v1468_v46 }
  0x5b   :  { %1151 = vmatpush3.bf16.msra.mxu1 %v1148_v13  ;;  %1247 = vmatpush3.bf16.msra.mxu0 %v1468_v46 }
  0x5c   :  { %1153 = vmatprep.subr.bf16.mxu1 %v1152_v17  ;;  %1249 = vmatprep.subr.bf16.mxu0 %v1486_v53 }
  0x5f   :  { %1155 = vmatpush3.bf16.msra.mxu1 %v1152_v17  ;;  %1251 = vmatpush3.bf16.msra.mxu0 %v1486_v53 }
  0x60   :  { %1157 = vmatprep.subr.bf16.mxu1 %v1156_v18  ;;  %1253 = vmatprep.subr.bf16.mxu0 %v1508_v60 }
  0x63   :  { %1159 = vmatpush3.bf16.msra.mxu1 %v1156_v18  ;;  %1255 = vmatpush3.bf16.msra.mxu0 %v1508_v60 }
  0x66   :  { %957 = vmatmul.mubr.f32.vlgmr.msra.gmra.mrb[0].mxu1 %v1478_v52  ;;  %1062 = vmatmul.mubr.f32.vlgmr.msra.gmra.mrb[0].mxu0 %v1444_v40 }
 0x139   :  { %v958_v25 = vpop.f32.mrb[0].mxu1  ;;  %v1063_v34 = vpop.f32.mrb[0].mxu0 }
 0x13a   :  { %v1256_v45 = vadd.f32 %v958_v25, %v745_v23  ;;  %v398_v46 = vpop.f32.mrb[1].mxu1  ;;  %v714_v49 = vpop.f32.mrb[1].mxu0 }
 0x13b   :  { %v1258_v53 = vadd.f32 %v745_v23, %v398_v46 }
 0x13c   :  { %v1257_v55 = vadd.f32 %v1256_v45, %v1063_v34 }
 0x13d   :  { %v1259_v59 = vadd.f32 %v1258_v53, %v714_v49 }
 0x13e   :  { %v725_v60 = vmax.f32 %v1257_v55, 0.0 }
 0x13f   :  { %v724_v52 = vmax.f32 %v1259_v59, 0.0 }
 0x140   :  { %728 = vst.msk [vmem:[#allocation2 + $0x8] sm:$0xff] %vm726_vm0, %v725_v60 }
 0x141   :  { %727 = vst.msk [vmem:[#allocation2] sm:$0xff] %vm726_vm0, %v724_v52 }
 0x142   :  { %1282 = shalt.err (!%p1279_p4)
}
 0x143   :  { %s1283_s25 = scalar_lea.hbm %s1656_s3, 256 }
 0x144   :  { %p1284_p5 = scmp.ne.s32.totalorder %s1656_s3, %s1283_s25  ;;  %p1287_p6 = scmp.lt.u32.totalorder %s1283_s25, %s1656_s3 }
 0x146   :  { %p1289_p7 = pnand %p1287_p6, %p1284_p5 }
 0x148   :  { %1292 = shalt.err (!%p1289_p7)
}
 0x149   :  { %s1296_s30 = smov 128   ;;  %s1297_s4 = smov 8  }
 0x14a   :  { %740 = dma.vmem_to_hbm [thread:$0]  %s735_s22, 256, %s1656_s3, [#allocation3], %s1296_s30, %s1296_s30, %s1297_s4  }
 0x14b   :  { %1293 = dma.done.wait [#allocation3], 256  }
 0x14c   :  { %1294 = vsyncadd [#allocation3], 4294967040 }
 0x14d   :  { %744 = vsyncpa [#allocation3], 1 }

</bundles_post_ra>
